<compile_context>
chip_gen: v5e
topology: v5e:2x2
jax: 0.10.0
libtpu: 0.0.40
codegen_flags: <defaults>
</compile_context>

<pallas_src>
import jax
import jax.numpy as jnp
from jax.experimental import pallas as pl
from jax.experimental.pallas import tpu as pltpu


def _round_up(x, m):
    return ((x + m - 1) // m) * m


def _linear_bias_kernel(x_ref, w_ref, b_ref, o_ref):
    # x_ref: (TM, H)   w_ref: (H, Np)   b_ref: (1, Np)   o_ref: (TM, Np)
    acc = jnp.dot(x_ref[...], w_ref[...], preferred_element_type=jnp.float32)
    o_ref[...] = (acc + b_ref[...]).astype(o_ref.dtype)


def _choose_tile_m(m, h, bytes_per_el=4):
    """Pick a row-tile so the double-buffered (TM, H) x slab stays ~<= 8 MiB.

    8 MiB is comfortably inside v7x's 64 MiB VMEM (and the 16/32 MiB default
    scoped limits on v5e/v6e) while still being large enough to amortize the
    ~0.35 us per-grid-step overhead.
    """
    budget = 8 * 1024 * 1024
    tm = budget // max(1, 2 * h * bytes_per_el)
    tm = max(8, min(1024, tm))
    tm = (tm // 8) * 8
    if m <= tm:
        return max(8, _round_up(m, 8))
    return tm


def enm_no_adaptor_classifier(seq_embedding, enm_input, weight, bias,
                              attention_mask=None, *, tile_m=None):
    """Pallas implementation of ENMNoAdaptorClassifier.forward.

    seq_embedding: (B, S, H) float32
    enm_input:     ignored (matches reference semantics)
    weight:        (H, out_dim) float32   (== torch_weight.T)
    bias:          (out_dim,)   float32
    tile_m:        optional override of the row-tile size (multiple of 8)
    """
    del enm_input, attention_mask  # unused, as in the reference module

    B, S, H = seq_embedding.shape
    out_dim = weight.shape[1]
    dtype = seq_embedding.dtype

    M = B * S
    x2d = seq_embedding.reshape(M, H)

    # Lane-dense output: pad out_dim up to a multiple of 128 with zero
    # columns so stores are unmasked full-lane vst. Zeros in the padded
    # columns keep the sliced logits bit-identical.
    n_pad = _round_up(out_dim, 128)
    if n_pad != out_dim:
        weight = jnp.pad(weight, ((0, 0), (0, n_pad - out_dim)))
        bias = jnp.pad(bias, (0, n_pad - out_dim))
    b2d = bias.reshape(1, n_pad).astype(dtype)
    w2d = weight.astype(dtype)

    # Row tiling (M axis). Pad M to a tile multiple so every block is full.
    tm = tile_m if tile_m is not None else _choose_tile_m(M, H)
    tm = max(8, (tm // 8) * 8)
    m_pad = _round_up(M, tm)
    if m_pad != M:
        x2d = jnp.pad(x2d, ((0, m_pad - M), (0, 0)))
    grid_m = m_pad // tm

    # VMEM: double-buffered x + resident weight/bias + double-buffered out.
    itemsize = jnp.dtype(dtype).itemsize
    vmem_needed = (2 * tm * H + H * n_pad + n_pad + 2 * tm * n_pad) * itemsize
    vmem_limit = int(min(64 * 1024 * 1024,
                         max(2 * vmem_needed, 16 * 1024 * 1024)))

    cost = pl.CostEstimate(
        flops=2 * m_pad * H * n_pad,
        transcendentals=0,
        bytes_accessed=(m_pad * H + H * n_pad + n_pad + m_pad * n_pad)
        * itemsize,
    )

    # NOTE: for tiny problems (M*H smaller than a few vreg tiles) plain XLA
    # fusion of `x @ w + b` is faster than any pallas_call launch; callers can
    # bypass this wrapper in that regime.
    out2d = pl.pallas_call(
        _linear_bias_kernel,
        out_shape=jax.ShapeDtypeStruct((m_pad, n_pad), dtype),
        grid_spec=pltpu.PrefetchScalarGridSpec(
            num_scalar_prefetch=0,
            grid=(grid_m,),
            in_specs=[
                pl.BlockSpec((tm, H), lambda i: (i, 0)),
                pl.BlockSpec((H, n_pad), lambda i: (0, 0)),
                pl.BlockSpec((1, n_pad), lambda i: (0, 0)),
            ],
            out_specs=pl.BlockSpec((tm, n_pad), lambda i: (i, 0)),
        ),
        compiler_params=pltpu.CompilerParams(
            dimension_semantics=("parallel",),
            vmem_limit_bytes=vmem_limit,
        ),
        cost_estimate=cost,
    )(x2d, w2d, b2d)

    return out2d[:M, :out_dim].reshape(B, S, out_dim)


if __name__ == "__main__":
    key = jax.random.PRNGKey(0)
    k_x, k_e, k_w, k_b = jax.random.split(key, 4)

    # Small shapes consistent with the module's forward.
    B, S = 2, 8                 # batch, sequence length
    seq_embedding_dim = 32      # hidden size of seq_embedding
    out_dim = 8                 # classifier output dim
    enm_dim = 16                # arbitrary; enm_input is ignored by the model

    seq_embedding = jax.random.normal(k_x, (B, S, seq_embedding_dim),
                                      dtype=jnp.float32)
    enm_input = jax.random.normal(k_e, (B, S, enm_dim), dtype=jnp.float32)

    # Deterministic parameter init (synthetic, not a checkpoint).
    weight = jax.random.normal(
        k_w, (seq_embedding_dim, out_dim), dtype=jnp.float32) * 0.05
    bias = jax.random.normal(k_b, (out_dim,), dtype=jnp.float32) * 0.05

    logits = enm_no_adaptor_classifier(seq_embedding, enm_input, weight, bias)
    logits = jax.block_until_ready(logits)

    ref = seq_embedding @ weight + bias
    assert logits.shape == (B, S, out_dim)
    assert jnp.allclose(logits, ref, atol=1e-5, rtol=1e-5)

    # Second check: multi-tile grid + ragged M (exercises row-padding path).
    B2, S2, H2 = 3, 100, 64
    x2 = jax.random.normal(k_x, (B2, S2, H2), dtype=jnp.float32)
    w2 = jax.random.normal(k_w, (H2, out_dim), dtype=jnp.float32) * 0.05
    b2 = jax.random.normal(k_b, (out_dim,), dtype=jnp.float32) * 0.05
    logits2 = enm_no_adaptor_classifier(x2, None, w2, b2, tile_m=128)
    logits2 = jax.block_until_ready(logits2)
    ref2 = x2 @ w2 + b2
    assert logits2.shape == (B2, S2, out_dim)
    assert jnp.allclose(logits2, ref2, atol=1e-5, rtol=1e-5)

    print("KERNEL_OK")
</pallas_src>

<mosaic_0001>
module attributes {stable_mosaic.version = 11 : i64} {
  func.func @_linear_bias_kernel(%arg0: i32, %arg1: memref<16x32xf32, #tpu.memory_space<vmem>>, %arg2: memref<32x128xf32, #tpu.memory_space<vmem>>, %arg3: memref<1x128xf32, #tpu.memory_space<vmem>>, %arg4: memref<16x128xf32, #tpu.memory_space<vmem>>) attributes {dimension_semantics = [#tpu.dimension_semantics<parallel>], iteration_bounds = array<i64: 1>, scalar_prefetch = 0 : i64, scratch_operands = 0 : i64, tpu.core_type = #tpu.core_type<tc>, window_params = [{transform_indices = @transform_0, window_bounds = array<i64: 16, 32>}, {pipeline_mode = #tpu.pipeline_mode<synchronous>, transform_indices = @transform_1, window_bounds = array<i64: 32, 128>}, {pipeline_mode = #tpu.pipeline_mode<synchronous>, transform_indices = @transform_2, window_bounds = array<i64: 1, 128>}, {transform_indices = @transform_3, window_bounds = array<i64: 16, 128>}]} {
    %c0 = arith.constant 0 : index
    %c0_0 = arith.constant 0 : index
    %0 = vector.load %arg1[%c0, %c0_0] : memref<16x32xf32, #tpu.memory_space<vmem>>, vector<16x32xf32>
    %c0_1 = arith.constant 0 : index
    %c0_2 = arith.constant 0 : index
    %1 = vector.load %arg2[%c0_1, %c0_2] : memref<32x128xf32, #tpu.memory_space<vmem>>, vector<32x128xf32>
    %cst = arith.constant dense<0.000000e+00> : vector<16x128xf32>
    %2 = tpu.matmul %0, %1, %cst {dimension_numbers = #tpu.dot_dimension_numbers<[1], [0], [0], [1], [0, 0, 1, 1], [], []>} : vector<16x32xf32>, vector<32x128xf32>, vector<16x128xf32> -> vector<16x128xf32>
    %c0_3 = arith.constant 0 : index
    %c0_4 = arith.constant 0 : index
    %3 = vector.load %arg3[%c0_3, %c0_4] : memref<1x128xf32, #tpu.memory_space<vmem>>, vector<1x128xf32>
    %4 = vector.broadcast %3 : vector<1x128xf32> to vector<16x128xf32>
    %5 = arith.addf %2, %4 : vector<16x128xf32>
    %c0_5 = arith.constant 0 : index
    %c0_6 = arith.constant 0 : index
    %6 = vector.load %arg4[%c0_5, %c0_6] : memref<16x128xf32, #tpu.memory_space<vmem>>, vector<16x128xf32>
    tpu.vector_store %arg4[%c0_5, %c0_6], %5 {strides = array<i32>} : memref<16x128xf32, #tpu.memory_space<vmem>>, vector<16x128xf32>,
    return
  }
  func.func @transform_0(%arg0: i32) -> (i32, i32) {
    %c0_i32 = arith.constant 0 : i32
    %c0_i32_0 = arith.constant 0 : i32
    return %arg0, %c0_i32 : i32, i32
  }
  func.func @transform_1(%arg0: i32) -> (i32, i32) {
    %c0_i32 = arith.constant 0 : i32
    %c0_i32_0 = arith.constant 0 : i32
    %c0_i32_1 = arith.constant 0 : i32
    return %c0_i32, %c0_i32_0 : i32, i32
  }
  func.func @transform_2(%arg0: i32) -> (i32, i32) {
    %c0_i32 = arith.constant 0 : i32
    %c0_i32_0 = arith.constant 0 : i32
    %c0_i32_1 = arith.constant 0 : i32
    return %c0_i32, %c0_i32_0 : i32, i32
  }
  func.func @transform_3(%arg0: i32) -> (i32, i32) {
    %c0_i32 = arith.constant 0 : i32
    %c0_i32_0 = arith.constant 0 : i32
    return %arg0, %c0_i32 : i32, i32
  }
}

</mosaic_0001>

<bundles_post_ra>
// kernel: tpu_custom_call.1
= control target key start
LH: loop header
LB: loop body
LE: loop exit
PB: predicated region body
PF: predicated region fallthrough
CT: control target
= control target key end

     0   :  { %8 = vsyncpa [#allocation3], 0  ;;  %s245_s0 = inlined_call_operand.hbm [shape: f32[16,32], index: 0, kind: input, shape index: {}]   ;;  %s246_s1 = inlined_call_operand.hbm [shape: f32[32,128], index: 1, kind: input, shape index: {}]   ;;  %s247_s2 = inlined_call_operand.vmem [shape: f32[1,128], index: 2, kind: input, shape index: {}]   ;;  %s248_s3 = inlined_call_operand.hbm [shape: f32[16,128], index: 3, kind: output, shape index: {}]  }
   0x1   :  { %9 = vsyncpa [#allocation6], 0 }
   0x2   :  { %10 = vsyncpa [#allocation4], 0  ;;  %s15_s14 = sshll.u32 %s245_s0, 4  ;;  %s199_s15 = smov [#allocation2]   ;;  %s16_s14 = int_to_ptr.hbm [resolvable:$true] %s15_s14 }
   0x3   :  { %s17_s16 = sshll.u32 %s199_s15, 4  ;;  %s28_s19 = sshll.u32 %s246_s1, 4  ;;  %s18_s16 = int_to_ptr.vmem [resolvable:$true] %s17_s16  ;;  %s29_s19 = int_to_ptr.hbm [resolvable:$true] %s28_s19 }
   0x4   :  { %s200_s20 = smov 128   ;;  %s201_s21 = smov 8  }
   0x5   :  { %23 = dma.hbm_to_vmem [thread:$0]  %s16_s14, 256, %s18_s16, [#allocation3], %s200_s20, %s200_s20, %s201_s21  }
   0x6   :  { %s202_s22 = smov [#allocation5]  }
   0x7   :  { %s30_s23 = sshll.u32 %s202_s22, 4  ;;  %s31_s23 = int_to_ptr.vmem [resolvable:$true] %s30_s23 }
   0x8   :  { %36 = dma.hbm_to_vmem [thread:$0]  %s29_s19, 512, %s31_s23, [#allocation6], %s200_s20, %s200_s20, %s201_s21  }
   0x9   :  { %193 = dma.done.wait [#allocation3], 256  }
   0xa   :  { %194 = vsyncadd [#allocation3], 4294967040 }
   0xb   :  { %195 = dma.done.wait [#allocation6], 512  }
   0xc   :  { %196 = vsyncadd [#allocation6], 4294966784  ;;  %v52_v0 = vld [vmem:[#allocation5 + $0x18] sm:$0xff]  ;;  %v51_v1 = vld [vmem:[#allocation5 + $0x10] sm:$0xff]  ;;  %vm57_vm0 = vcmask 261120   ;;  %s203_s24 = smov [#allocation7]  }
   0xd   :  { %76 = vmatpush.msra.mxu0 %v52_v0  ;;  %111 = vmatpush.msra.mxu1 %v52_v0  ;;  %v50_v2 = vld [vmem:[#allocation5 + $0x8] sm:$0xff]  ;;  %v49_v3 = vld [vmem:[#allocation5] sm:$0xff]  ;;  %v47_v4 = vld [vmem:[#allocation2] sm:$0xff]  ;;  %s93_s25 = sshll.u32 %s203_s24, 4  ;;  %s95_s28 = sshll.u32 %s248_s3, 4  ;;  %s94_s25 = int_to_ptr.vmem [resolvable:$true] %s93_s25  ;;  %s96_s28 = int_to_ptr.hbm [resolvable:$true] %s95_s28 }
   0xe   :  { %v48_v5 = vld [vmem:[#allocation2 + $0x8] sm:$0xff]  ;;  %v120_v6 = vld [vmem:[%s247_s2] ss:$0 sm:$0xff] }
   0xf   :  { %77 = vmatpush.msra.mxu0 %v51_v1  ;;  %112 = vmatpush.msra.mxu1 %v51_v1 }
  0x11   :  { %78 = vmatpush.msra.mxu0 %v50_v2  ;;  %113 = vmatpush.msra.mxu1 %v50_v2 }
  0x13   :  { %79 = vmatpush.msra.mxu0 %v49_v3  ;;  %114 = vmatpush.msra.mxu1 %v49_v3 }
  0x14   :  { %109 = vmatmul.msk.f32.vlgmr.msra.gmra.mxu0 %vm57_vm0, %v47_v4  ;;  %110 = vmatmul.msk.f32.vlgmr.msra.gmra.mxu1 %vm57_vm0, %v48_v5 }
  0x91   :  { %v81_v7 = vpop.f32.mrf.mxu0  ;;  %v84_v8 = vpop.f32.mrf.mxu1 }
  0x92   :  { %v82_v9 = vadd.f32 %v120_v6, %v81_v7  ;;  %v85_v10 = vadd.f32 %v120_v6, %v84_v8 }
  0x94   :  { %87 = vst [vmem:[#allocation7] sm:$0xff] %v82_v9 }
  0x95   :  { %88 = vst [vmem:[#allocation7 + $0x8] sm:$0xff] %v85_v10 }
  0x96   :  { %101 = dma.vmem_to_hbm [thread:$0]  %s94_s25, 256, %s96_s28, [#allocation4], %s200_s20, %s200_s20, %s201_s21  }
  0x97   :  { %197 = dma.done.wait [#allocation4], 256  }
  0x98   :  { %198 = vsyncadd [#allocation4], 4294967040 }
  0x99   :  { %106 = vsyncpa [#allocation3], 1 }
  0x9a   :  { %107 = vsyncpa [#allocation6], 1 }
  0x9b   :  { %108 = vsyncpa [#allocation4], 1 }

</bundles_post_ra>
